<compile_context>
chip_gen: v7x
topology: tpu7x:2x2x1
jax: 0.10.0
libtpu: 0.0.40
codegen_flags: <defaults>
</compile_context>

<pallas_src>
import math

import jax
import jax.numpy as jnp
from jax.experimental import pallas as pl
from jax.experimental.pallas import tpu as pltpu


def _round_up(x, m):
    return ((x + m - 1) // m) * m


def _sublane_multiple(dtype):
    # Native sublane packing: 8 rows for 4-byte, 16 for 2-byte, 32 for 1-byte.
    return max(8, 32 // jnp.dtype(dtype).itemsize)


def _divisor_tile(dim_al, unit, max_tile):
    """Largest multiple of `unit` that divides `dim_al` and is <= max_tile
    (always at least `unit`).  `dim_al` must be a multiple of `unit`."""
    q = dim_al // unit
    cap = max(max_tile // unit, 1)
    best = 1
    d = 1
    while d * d <= q:
        if q % d == 0:
            for c in (d, q // d):
                if best < c <= cap:
                    best = c
        d += 1
    return best * unit


def _make_fc_kernel(nk):
    """Kernel factory; nk (number of K blocks) is static, so the single-block
    case gets a scratch-free kernel with no accumulator traffic at all."""
    if nk == 1:
        def kernel(x_ref, w_ref, b_ref, o_ref):
            # x_ref: (tm, tk)  w_ref: (tk, tn)  b_ref: (1, tn)  o_ref: (tm, tn)
            o_ref[...] = (
                jnp.dot(x_ref[...], w_ref[...], preferred_element_type=jnp.float32)
                + b_ref[...]
            ).astype(o_ref.dtype)
        return kernel

    def kernel(x_ref, w_ref, b_ref, o_ref, acc_ref):
        k = pl.program_id(2)
        partial = jnp.dot(x_ref[...], w_ref[...],
                          preferred_element_type=jnp.float32)

        @pl.when(k == 0)
        def _():
            acc_ref[...] = partial

        @pl.when(jnp.logical_and(k > 0, k < nk - 1))
        def _():
            acc_ref[...] += partial

        @pl.when(k == nk - 1)
        def _():
            # Final partial + bias go straight into o_ref: saves one full
            # (tm, tn) f32 accumulator store + reload per output block.
            o_ref[...] = (acc_ref[...] + partial + b_ref[...]).astype(o_ref.dtype)

    return kernel


def init_fc_params(key, in_dim, out_dim, dtype=jnp.float32):
    """Replicates FC.reset_parameters():
       xavier_uniform_ on weight (out_dim, in_dim), zeros on bias."""
    limit = math.sqrt(6.0 / (in_dim + out_dim))
    weight = jax.random.uniform(
        key, (out_dim, in_dim), dtype=dtype, minval=-limit, maxval=limit)
    bias = jnp.zeros((out_dim,), dtype=dtype)
    return weight, bias


def prepare_fc_params(weight, bias, compute_dtype=None):
    """One-time parameter prep (do at init, NOT per forward call):
    transpose W to (in_dim, out_dim), zero-pad both dims to multiples of 128,
    pad the bias, and optionally cast the weight to a low-precision compute
    dtype (e.g. jnp.bfloat16).  This amortizes the transpose / pad / cast HBM
    passes over the parameter lifetime instead of paying them every call."""
    out_dim, in_dim = weight.shape
    k_al = _round_up(in_dim, 128)
    n_al = _round_up(out_dim, 128)
    w_t = weight.T                                   # (in_dim, out_dim)
    if (k_al, n_al) != (in_dim, out_dim):
        w_t = jnp.pad(w_t, ((0, k_al - in_dim), (0, n_al - out_dim)))
    if compute_dtype is not None:
        w_t = w_t.astype(compute_dtype)
    b = bias if n_al == out_dim else jnp.pad(bias, (0, n_al - out_dim))
    b2d = b.reshape(1, n_al).astype(jnp.float32)
    return {"w_t": w_t, "b2d": b2d, "in_dim": in_dim, "out_dim": out_dim}


def fc_forward(x, params, *, tm_max=512, tn_max=512, tk_max=1024):
    """x: (B, in_dim) -> (B, out_dim).  `params` comes from prepare_fc_params."""
    w_t, b2d = params["w_t"], params["b2d"]
    in_dim, out_dim = params["in_dim"], params["out_dim"]
    B, x_in = x.shape
    assert x_in == in_dim, (x_in, in_dim)
    k_al, n_al = w_t.shape

    out_dtype = x.dtype
    compute_dtype = w_t.dtype
    if x.dtype != compute_dtype:
        x = x.astype(compute_dtype)

    sub = _sublane_multiple(compute_dtype)        # 8 (f32) / 16 (bf16) / 32 (8-bit)
    m_al = _round_up(B, sub)

    # Even M split: small batch (m_al <= tm_max) -> a single M block so the
    # weight is streamed from HBM exactly once; otherwise near-equal blocks.
    grid_m = pl.cdiv(m_al, tm_max)
    tm = _round_up(pl.cdiv(m_al, grid_m), sub)
    m_pad = grid_m * tm

    # tn / tk must divide the pre-padded weight dims (no per-call W padding).
    tn = _divisor_tile(n_al, 128, tn_max)
    # v7x has two TensorCores: if the M grid collapsed to 1, keep >= 2 blocks
    # on the (parallel) N axis so both cores get work (neutral on v5e/v6e).
    if grid_m == 1 and n_al // tn < 2 and n_al >= 256:
        tn = _divisor_tile(n_al, 128, n_al // 2)
    tk = _divisor_tile(k_al, 128, tk_max)

    grid = (grid_m, n_al // tn, k_al // tk)
    nk = grid[2]

    # Only x is padded per call (zeros are exact no-ops for the matmul).
    x_p = x
    if (m_pad, k_al) != (B, in_dim):
        x_p = jnp.pad(x, ((0, m_pad - B), (0, k_al - in_dim)))

    in_b = jnp.dtype(compute_dtype).itemsize
    out_b = jnp.dtype(out_dtype).itemsize
    # Double-buffered pipeline footprint + resident f32 accumulator.
    vmem_bytes = 2 * (tm * tk * in_b + tk * tn * in_b + tm * tn * out_b + tn * 4)
    if nk > 1:
        vmem_bytes += tm * tn * 4
    vmem_limit = int(min(max(vmem_bytes * 3 // 2, 32 << 20), 56 << 20))

    cost = pl.CostEstimate(
        flops=2 * m_pad * k_al * n_al,
        transcendentals=0,
        bytes_accessed=(m_pad * k_al + k_al * n_al) * in_b + m_pad * n_al * out_b,
    )

    scratch = [] if nk == 1 else [pltpu.VMEM((tm, tn), jnp.float32)]

    out_p = pl.pallas_call(
        _make_fc_kernel(nk),
        out_shape=jax.ShapeDtypeStruct((m_pad, n_al), out_dtype),
        grid_spec=pltpu.PrefetchScalarGridSpec(
            num_scalar_prefetch=0,
            grid=grid,
            in_specs=[
                pl.BlockSpec((tm, tk), lambda i, j, k: (i, k)),  # x tile
                pl.BlockSpec((tk, tn), lambda i, j, k: (k, j)),  # W tile (K on sublanes, N on lanes)
                pl.BlockSpec((1, tn), lambda i, j, k: (0, j)),   # bias tile
            ],
            out_specs=pl.BlockSpec((tm, tn), lambda i, j, k: (i, j)),
            scratch_shapes=scratch,
        ),
        compiler_params=pltpu.CompilerParams(
            dimension_semantics=("parallel", "parallel", "arbitrary"),
            vmem_limit_bytes=vmem_limit,
        ),
        cost_estimate=cost,
    )(x_p, w_t, b2d)

    if (m_pad, n_al) != (B, out_dim):
        out_p = out_p[:B, :out_dim]
    return out_p


if __name__ == "__main__":
    key = jax.random.PRNGKey(0)
    k_x, k_w, k_x2, k_w2 = jax.random.split(key, 4)

    # --- small demo shapes matching the module (padded internally) ---
    batch, in_dim, out_dim = 8, 32, 16
    x = jax.random.normal(k_x, (batch, in_dim), dtype=jnp.float32)
    weight, bias = init_fc_params(k_w, in_dim, out_dim)
    params = prepare_fc_params(weight, bias)

    out = fc_forward(x, params)
    jax.block_until_ready(out)
    ref = x @ weight.T + bias
    assert out.shape == (batch, out_dim)
    assert jnp.allclose(out, ref, atol=1e-5, rtol=1e-5)

    # --- multi-tile f32 check (K accumulation + N tiling + finalize path) ---
    B2, K2, N2 = 512, 2304, 384
    x2 = jax.random.normal(k_x2, (B2, K2), dtype=jnp.float32)
    w2, b2 = init_fc_params(k_w2, K2, N2)
    b2 = b2 + 0.5  # non-zero bias to test the finalize path
    params2 = prepare_fc_params(w2, b2)
    out2 = fc_forward(x2, params2)
    jax.block_until_ready(out2)
    ref2 = x2 @ w2.T + b2
    assert out2.shape == (B2, N2)
    assert jnp.allclose(out2, ref2, atol=2e-3, rtol=2e-3)

    # --- bf16 compute path (f32 MXU accumulation preserved in-kernel) ---
    params2_bf16 = prepare_fc_params(w2, b2, compute_dtype=jnp.bfloat16)
    out3 = fc_forward(x2, params2_bf16)
    jax.block_until_ready(out3)
    assert out3.shape == (B2, N2)
    assert jnp.allclose(out3, ref2, atol=2e-1, rtol=5e-2)

    print("KERNEL_OK")
</pallas_src>

<mosaic_0001>
module attributes {stable_mosaic.version = 11 : i64} {
  func.func @kernel(%arg0: i32, %arg1: i32, %arg2: i32, %arg3: memref<8x128xf32, #tpu.memory_space<vmem>>, %arg4: memref<128x128xf32, #tpu.memory_space<vmem>>, %arg5: memref<1x128xf32, #tpu.memory_space<vmem>>, %arg6: memref<8x128xf32, #tpu.memory_space<vmem>>) attributes {dimension_semantics = [#tpu.dimension_semantics<parallel>, #tpu.dimension_semantics<parallel>, #tpu.dimension_semantics<arbitrary>], iteration_bounds = array<i64: 1, 1, 1>, scalar_prefetch = 0 : i64, scratch_operands = 0 : i64, tpu.core_type = #tpu.core_type<tc>, window_params = [{transform_indices = @transform_0, window_bounds = array<i64: 8, 128>}, {transform_indices = @transform_1, window_bounds = array<i64: 128, 128>}, {transform_indices = @transform_2, window_bounds = array<i64: 1, 128>}, {transform_indices = @transform_3, window_bounds = array<i64: 8, 128>}]} {
    %c0 = arith.constant 0 : index
    %c0_0 = arith.constant 0 : index
    %0 = vector.load %arg3[%c0, %c0_0] : memref<8x128xf32, #tpu.memory_space<vmem>>, vector<8x128xf32>
    %c0_1 = arith.constant 0 : index
    %c0_2 = arith.constant 0 : index
    %1 = vector.load %arg4[%c0_1, %c0_2] : memref<128x128xf32, #tpu.memory_space<vmem>>, vector<128x128xf32>
    %cst = arith.constant dense<0.000000e+00> : vector<8x128xf32>
    %2 = tpu.matmul %0, %1, %cst {dimension_numbers = #tpu.dot_dimension_numbers<[1], [0], [0], [1], [0, 0, 1, 1], [], []>} : vector<8x128xf32>, vector<128x128xf32>, vector<8x128xf32> -> vector<8x128xf32>
    %c0_3 = arith.constant 0 : index
    %c0_4 = arith.constant 0 : index
    %3 = vector.load %arg5[%c0_3, %c0_4] : memref<1x128xf32, #tpu.memory_space<vmem>>, vector<1x128xf32>
    %4 = vector.broadcast %3 : vector<1x128xf32> to vector<8x128xf32>
    %5 = arith.addf %2, %4 : vector<8x128xf32>
    %c0_5 = arith.constant 0 : index
    %c0_6 = arith.constant 0 : index
    %6 = vector.load %arg6[%c0_5, %c0_6] : memref<8x128xf32, #tpu.memory_space<vmem>>, vector<8x128xf32>
    tpu.vector_store %arg6[%c0_5, %c0_6], %5 {strides = array<i32>} : memref<8x128xf32, #tpu.memory_space<vmem>>, vector<8x128xf32>,
    return
  }
  func.func @transform_0(%arg0: i32, %arg1: i32, %arg2: i32) -> (i32, i32) {
    %c0_i32 = arith.constant 0 : i32
    return %arg0, %arg2 : i32, i32
  }
  func.func @transform_1(%arg0: i32, %arg1: i32, %arg2: i32) -> (i32, i32) {
    %c0_i32 = arith.constant 0 : i32
    return %arg2, %arg1 : i32, i32
  }
  func.func @transform_2(%arg0: i32, %arg1: i32, %arg2: i32) -> (i32, i32) {
    %c0_i32 = arith.constant 0 : i32
    %c0_i32_0 = arith.constant 0 : i32
    return %c0_i32, %arg1 : i32, i32
  }
  func.func @transform_3(%arg0: i32, %arg1: i32, %arg2: i32) -> (i32, i32) {
    %c0_i32 = arith.constant 0 : i32
    return %arg0, %arg1 : i32, i32
  }
}

</mosaic_0001>

<bundles_post_ra>
// kernel: tpu_custom_call.1
= control target key start
LH: loop header
LB: loop body
LE: loop exit
PB: predicated region body
PF: predicated region fallthrough
CT: control target
= control target key end

     0   :  { %8 = vsyncpa [#allocation3], 0  ;;  %s383_s0 = inlined_call_operand.hbm [shape: f32[8,128], index: 0, kind: input, shape index: {}]   ;;  %s384_s1 = inlined_call_operand.hbm [shape: f32[128,128], index: 1, kind: input, shape index: {}]   ;;  %s385_s2 = inlined_call_operand.vmem [shape: f32[1,128], index: 2, kind: input, shape index: {}]   ;;  %s386_s3 = inlined_call_operand.hbm [shape: f32[8,128], index: 3, kind: output, shape index: {}]  }
   0x1   :  { %9 = vsyncpa [#allocation6], 0 }
   0x2   :  { %10 = vsyncpa [#allocation4], 0  ;;  %s309_s12 = smov [#allocation2]   ;;  %s310_s14 = smov [#allocation5]  }
   0x3   :  { %s17_s13 = sshll.u32 %s309_s12, 4  ;;  %s26_s15 = sshll.u32 %s310_s14, 4  ;;  %s18_s13 = int_to_ptr.vmem [resolvable:$true] %s17_s13  ;;  %s337_s15 = int_to_ptr.vmem [resolvable:$true] %s26_s15 }
   0x4   :  { %s237_s18 = scalar_lea.hbm %s383_s0, 128 }
   0x5   :  { %p238_p0 = scmp.ne.s32.totalorder %s383_s0, %s237_s18  ;;  %p241_p1 = scmp.lt.u32.totalorder %s237_s18, %s383_s0 }
   0x7   :  { %p243_p2 = pnand %p241_p1, %p238_p0 }
   0x9   :  { %246 = shalt.err (!%p243_p2)
}
   0xa   :  { %s247_s23 = scalar_lea.vmem %s18_s13, 128  ;;  %p252_p4 = scmp.lt.s32.totalorder %s18_s13, %s18_s13 }
   0xb   :  { %p248_p3 = scmp.ne.s32.totalorder %s18_s13, %s247_s23  ;;  %p253_p5 = scmp.lt.s32.totalorder %s247_s23, %s247_s23 }
   0xd   :  { %p254_p6 = por %p253_p5, %p252_p4 }
   0xf   :  { %p255_p7 = pnand %p254_p6, %p248_p3 }
  0x11   :  { %258 = shalt.err (!%p255_p7)
}
  0x12   :  { %20 = dma.hbm_to_vmem [thread:$0]  %s383_s0, 128, %s18_s13, [#allocation3]  }
  0x13   :  { %s259_s28 = scalar_lea.hbm %s384_s1, 2048 }
  0x14   :  { %p260_p8 = scmp.ne.s32.totalorder %s384_s1, %s259_s28  ;;  %p263_p9 = scmp.lt.u32.totalorder %s259_s28, %s384_s1 }
  0x16   :  { %p265_p10 = pnand %p263_p9, %p260_p8 }
  0x18   :  { %268 = shalt.err (!%p265_p10)
}
  0x19   :  { %s269_s6 = scalar_lea.vmem %s337_s15, 2048  ;;  %p274_p12 = scmp.lt.s32.totalorder %s337_s15, %s337_s15 }
  0x1a   :  { %p270_p11 = scmp.ne.s32.totalorder %s337_s15, %s269_s6  ;;  %p275_p13 = scmp.lt.s32.totalorder %s269_s6, %s269_s6 }
  0x1c   :  { %p276_p0 = por %p275_p13, %p274_p12 }
  0x1e   :  { %p277_p1 = pnand %p276_p0, %p270_p11 }
  0x20   :  { %280 = shalt.err (!%p277_p1)
}
  0x21   :  { %s311_s0 = smov 128   ;;  %s312_s7 = smov 8  }
  0x22   :  { %32 = dma.hbm_to_vmem [thread:$0]  %s384_s1, 2048, %s337_s15, [#allocation6], %s311_s0, %s311_s0, %s312_s7  }
  0x23   :  { %303 = dma.done.wait [#allocation3], 128  }
  0x24   :  { %304 = vsyncadd [#allocation3], 4294967168 }
  0x25   :  { %305 = dma.done.wait [#allocation6], 2048  }
  0x26   :  { %306 = vsyncadd [#allocation6], 4294965248  ;;  %v313_v0 = vmov 0.0|0.0   ;;  %vm314_vm0 = vmmov 0   ;;  %v315_v1 = vmov 0.0   ;;  %v42_v2 = vld [vmem:[#allocation5] sm:$0xff] }
  0x27   :  { %205 = vmatprep.subr.bf16.mxu0 %v313_v0  ;;  %202 = vmatprep.mubr.msk.f32.mxu0 %vm314_vm0, %v315_v1  ;;  %v43_v3 = vld [vmem:[#allocation5 + $0x8] sm:$0xff]  ;;  %v44_v4 = vld [vmem:[#allocation5 + $0x10] sm:$0xff]  ;;  %v45_v6 = vld [vmem:[#allocation5 + $0x18] sm:$0xff]  ;;  %s316_s11 = smov [#allocation7]  }
  0x28   :  { %v206_v5 = vpack.c.bf16 %v43_v3, %v42_v2  ;;  %v209_v7 = vpack.c.bf16 %v45_v6, %v44_v4  ;;  %v46_v8 = vld [vmem:[#allocation5 + $0x20] sm:$0xff]  ;;  %v47_v9 = vld [vmem:[#allocation5 + $0x28] sm:$0xff]  ;;  %v48_v11 = vld [vmem:[#allocation5 + $0x30] sm:$0xff]  ;;  %s142_s12 = sshll.u32 %s316_s11, 4  ;;  %s143_s12 = int_to_ptr.vmem [resolvable:$true] %s142_s12 }
  0x29   :  { %v212_v10 = vpack.c.bf16 %v47_v9, %v46_v8  ;;  %v49_v12 = vld [vmem:[#allocation5 + $0x38] sm:$0xff]  ;;  %v50_v14 = vld [vmem:[#allocation5 + $0x40] sm:$0xff]  ;;  %v51_v15 = vld [vmem:[#allocation5 + $0x48] sm:$0xff]  ;;  %s281_s13 = scalar_lea.vmem %s143_s12, 128  ;;  %p286_p3 = scmp.lt.s32.totalorder %s143_s12, %s143_s12 }
  0x2a   :  { %207 = vmatpush3.bf16.msra.mxu0 %v206_v5  ;;  %v215_v13 = vpack.c.bf16 %v49_v12, %v48_v11  ;;  %v218_v16 = vpack.c.bf16 %v51_v15, %v50_v14  ;;  %v52_v17 = vld [vmem:[#allocation5 + $0x50] sm:$0xff]  ;;  %v53_v18 = vld [vmem:[#allocation5 + $0x58] sm:$0xff]  ;;  %v54_v20 = vld [vmem:[#allocation5 + $0x60] sm:$0xff]  ;;  %p282_p2 = scmp.ne.s32.totalorder %s143_s12, %s281_s13  ;;  %p287_p4 = scmp.lt.s32.totalorder %s281_s13, %s281_s13 }
  0x2b   :  { %208 = vmatprep.subr.bf16.mxu0 %v313_v0  ;;  %v221_v19 = vpack.c.bf16 %v53_v18, %v52_v17  ;;  %v55_v21 = vld [vmem:[#allocation5 + $0x68] sm:$0xff]  ;;  %v56_v23 = vld [vmem:[#allocation5 + $0x70] sm:$0xff]  ;;  %v57_v24 = vld [vmem:[#allocation5 + $0x78] sm:$0xff] }
  0x2c   :  { %v224_v22 = vpack.c.bf16 %v55_v21, %v54_v20  ;;  %v227_v25 = vpack.c.bf16 %v57_v24, %v56_v23  ;;  %v41_v26 = vld [vmem:[#allocation2] sm:$0xff]  ;;  %p288_p5 = por %p287_p4, %p286_p3 }
  0x2d   :  { %v152_v27 = vld [vmem:[%s385_s2] ss:$0 sm:$0xff] }
  0x2e   :  { %210 = vmatpush3.bf16.msra.mxu0 %v209_v7  ;;  %p289_p6 = pnand %p288_p5, %p282_p2 }
  0x2f   :  { %211 = vmatprep.subr.bf16.mxu0 %v313_v0 }
  0x32   :  { %213 = vmatpush3.bf16.msra.mxu0 %v212_v10 }
  0x33   :  { %214 = vmatprep.subr.bf16.mxu0 %v313_v0 }
  0x36   :  { %216 = vmatpush3.bf16.msra.mxu0 %v215_v13 }
  0x37   :  { %217 = vmatprep.subr.bf16.mxu0 %v313_v0 }
  0x3a   :  { %219 = vmatpush3.bf16.msra.mxu0 %v218_v16 }
  0x3b   :  { %220 = vmatprep.subr.bf16.mxu0 %v313_v0 }
  0x3e   :  { %222 = vmatpush3.bf16.msra.mxu0 %v221_v19 }
  0x3f   :  { %223 = vmatprep.subr.bf16.mxu0 %v313_v0 }
  0x42   :  { %225 = vmatpush3.bf16.msra.mxu0 %v224_v22 }
  0x43   :  { %226 = vmatprep.subr.bf16.mxu0 %v313_v0 }
  0x46   :  { %228 = vmatpush3.bf16.msra.mxu0 %v227_v25 }
  0x49   :  { %203 = vmatmul.mubr.f32.vlgmr.msra.gmra.mrb[0].mxu0 %v41_v26 }
 0x11c   :  { %v131_v28 = vpop.f32.mrb[0].mxu0 }
 0x11d   :  { %v132_v29 = vadd.f32 %v152_v27, %v131_v28  ;;  %v204_v30 = vpop.f32.mrb[1].mxu0 }
 0x11f   :  { %135 = vst [vmem:[#allocation7] sm:$0xff] %v132_v29 }
 0x120   :  { %292 = shalt.err (!%p289_p6)
}
 0x121   :  { %s293_s16 = scalar_lea.hbm %s386_s3, 128 }
 0x122   :  { %p294_p7 = scmp.ne.s32.totalorder %s386_s3, %s293_s16  ;;  %p297_p8 = scmp.lt.u32.totalorder %s293_s16, %s386_s3 }
 0x124   :  { %p299_p9 = pnand %p297_p8, %p294_p7 }
 0x126   :  { %302 = shalt.err (!%p299_p9)
}
 0x127   :  { %145 = dma.vmem_to_hbm [thread:$0]  %s143_s12, 128, %s386_s3, [#allocation4]  }
 0x128   :  { %307 = dma.done.wait [#allocation4], 128  }
 0x129   :  { %308 = vsyncadd [#allocation4], 4294967168 }
 0x12a   :  { %149 = vsyncpa [#allocation3], 1 }
 0x12b   :  { %150 = vsyncpa [#allocation6], 1 }
 0x12c   :  { %151 = vsyncpa [#allocation4], 1 }

</bundles_post_ra>
